<compile_context>
chip_gen: v7x
topology: tpu7x:2x2x1
jax: 0.10.0
libtpu: 0.0.40
codegen_flags: <defaults>
</compile_context>

<pallas_src>
import functools

import jax
import jax.numpy as jnp
import numpy as np
from jax.experimental import pallas as pl
from jax.experimental.pallas import tpu as pltpu


def _round_up(x, m):
    return (x + m - 1) // m * m


# --------------------------------------------------------------------------- #
# Pass 1: partial sums of q_fg = softmax(pred[:, :-1]) over row tiles.
# --------------------------------------------------------------------------- #
def _sum_qfg_kernel(pred_ref, sumq_ref, acc_ref, *,
                    n_rows, n_inner, tile_rows, slab_rows):
    o = pl.program_id(0)
    i = pl.program_id(1)

    @pl.when(i == 0)
    def _():
        acc_ref[...] = jnp.zeros_like(acc_ref)

    c = pred_ref.shape[1]
    base = (o * n_inner + i) * tile_rows          # logical (unclamped) row offset

    # Tiny hoisted constants (built once per grid step, reused by every slab).
    lane = jax.lax.broadcasted_iota(jnp.int32, (1, c), 1)
    is_fg = lane < (c - 1)                                           # (1, C)
    fg_col = (jax.lax.broadcasted_iota(jnp.int32, (c, 1), 0)
              < (c - 1)).astype(jnp.float32)                         # (C, 1): fg=1, bg=0
    ones_rows = jnp.ones((1, slab_rows), jnp.float32)
    row_iota = jax.lax.broadcasted_iota(jnp.int32, (slab_rows, 1), 0)

    # Slab-wise compute over the resident DMA tile: caps VMEM temporaries.
    @pl.loop(0, tile_rows // slab_rows)
    def _(j):
        r0 = pl.multiple_of(j * slab_rows, slab_rows)
        p = pred_ref[pl.ds(r0, slab_rows), :].astype(jnp.float32)    # (S, C)

        # Softmax over foreground lanes; mask the exp *argument* so the background
        # lane never produces inf (bg lane -> exp(0) = 1, harmless).
        m_fg = jnp.max(jnp.where(is_fg, p, jnp.float32(-1e30)), axis=-1, keepdims=True)
        e = jnp.exp(jnp.where(is_fg, p, m_fg) - m_fg)
        # Lane sum of the fg exponentials on the idle MXU (fg_col also masks bg).
        s_fg = jnp.dot(e, fg_col, preferred_element_type=jnp.float32)   # (S, 1)
        q = e * pl.reciprocal(s_fg, approx=False)    # bg lane garbage; never read later

        # Zero rows past the real array end (ragged / clamped-overrun tiles).
        # jnp.where does not propagate NaN from the unselected branch.
        valid = (base + r0 + row_iota) < n_rows
        q = jnp.where(valid, q, 0.0)

        # Row (sublane) reduction on the MXU: ones(1,S) @ q -> (1, C).
        acc_ref[...] += jnp.dot(ones_rows, q, preferred_element_type=jnp.float32)

    @pl.when(i == n_inner - 1)
    def _():
        sumq_ref[...] = acc_ref[...].reshape(1, 1, c)


# --------------------------------------------------------------------------- #
# Pass 2: partial sums of the weighted cross-entropy loss over row tiles.
# --------------------------------------------------------------------------- #
def _weighted_ce_kernel(pred_ref, label_ref, w_ref, loss_ref, acc_ref, *,
                        n_rows, n_inner, tile_rows, slab_rows, ignore_index):
    o = pl.program_id(0)
    i = pl.program_id(1)

    @pl.when(i == 0)
    def _():
        acc_ref[...] = jnp.zeros_like(acc_ref)

    c = pred_ref.shape[1]
    base = (o * n_inner + i) * tile_rows
    w = w_ref[...]                                                   # (1, C)

    lane = jax.lax.broadcasted_iota(jnp.int32, (1, c), 1)            # (1, C)
    ones_c = jnp.ones((c, 1), jnp.float32)
    row_iota = jax.lax.broadcasted_iota(jnp.int32, (slab_rows, 1), 0)

    @pl.loop(0, tile_rows // slab_rows)
    def _(j):
        r0 = pl.multiple_of(j * slab_rows, slab_rows)
        p = pred_ref[pl.ds(r0, slab_rows), :].astype(jnp.float32)    # (S, C)
        lbl = label_ref[pl.ds(r0, slab_rows), :]                     # (S, 1) int32

        scaled = w * p
        m = jnp.max(scaled, axis=-1, keepdims=True)                  # only XLU lane op left
        # Lane sums on the idle MXU.
        se = jnp.dot(jnp.exp(scaled - m), ones_c,
                     preferred_element_type=jnp.float32)             # (S, 1)
        lse = m + jnp.log(se)
        picked = jnp.dot(jnp.where(lane == lbl, scaled, 0.0), ones_c,
                         preferred_element_type=jnp.float32)         # (S, 1)
        loss = lse - picked

        # Mask rows past the array end and ignore_index rows.
        valid = jnp.logical_and((base + r0 + row_iota) < n_rows, lbl != ignore_index)
        loss = jnp.where(valid, loss, 0.0)

        acc_ref[...] += jnp.sum(loss, axis=0, keepdims=True)         # (1, 1)

    @pl.when(i == n_inner - 1)
    def _():
        loss_ref[...] = acc_ref[...].reshape(1, 1, 1)


# --------------------------------------------------------------------------- #
# Wrapper
# --------------------------------------------------------------------------- #
def ada_rel_iif_loss(cls_score, label, *, loss_weight=1.0, ignore_index=None,
                     tile_rows=None, core_splits=2):
    """cls_score: (N, C) f32/bf16 logits (background class last); label: (N,) int.

    Returns the scalar ADARELIIF loss for reduction='mean', weight=None,
    avg_factor=None, class_weight=None.  The mean divides by all N rows (mmdet
    weight_reduce_loss semantics), including ignore_index rows which contribute 0.
    Since pred is streamed from HBM twice, bf16 logits are recommended for large N
    (the kernel upcasts per-slab in VMEM).
    """
    ignore_index = -100 if ignore_index is None else int(ignore_index)
    n, c = cls_score.shape
    itemsize = jnp.dtype(cls_score.dtype).itemsize

    # DMA tile: start at 8192 rows; shrink only while the double-buffered pred tile
    # plus the lane-padded (tn,1)->(tn,128) int32 label tile exceed ~24 MiB (safe on
    # v7x's 64 MiB VMEM with slab-wise compute).  Floor 512 rows amortizes the
    # ~0.35 us fixed per-step overhead.
    if tile_rows is None:
        tile_rows = 8192
        while tile_rows > 512 and 2 * tile_rows * (c * itemsize + 128 * 4) > (24 << 20):
            tile_rows //= 2
    tn = _round_up(max(16, min(int(tile_rows), n)), 16)

    # Compute slab: <= 256 rows, must divide the DMA tile (tn is a multiple of 16).
    slab = min(256, tn)
    while tn % slab != 0:
        slab //= 2

    n_tiles = pl.cdiv(n, tn)
    n_outer = core_splits if n_tiles >= core_splits else 1   # one partial per TC
    n_inner = pl.cdiv(n_tiles, n_outer)
    last_block = n_tiles - 1

    label2d = label.astype(jnp.int32).reshape(n, 1)

    # No host-side padding: the last real block may be ragged (masked in-kernel);
    # logical tiles past the last real tile (when n_outer*n_inner > n_tiles) are
    # clamped to the last block so no fully-OOB DMA is issued — their rows all have
    # global_row >= n and are masked to zero.
    def row_block(o, i):
        return (jnp.minimum(o * n_inner + i, last_block), 0)

    grid = (n_outer, n_inner)
    pred_spec = pl.BlockSpec((tn, c), row_block)
    label_spec = pl.BlockSpec((tn, 1), row_block)
    cparams = pltpu.CompilerParams(
        dimension_semantics=("parallel", "arbitrary"),
        vmem_limit_bytes=48 * 1024 * 1024)

    # ---- pass 1: per-core partial sums of q_fg over row tiles ---------------
    sumq_parts = pl.pallas_call(
        functools.partial(_sum_qfg_kernel, n_rows=n, n_inner=n_inner,
                          tile_rows=tn, slab_rows=slab),
        out_shape=jax.ShapeDtypeStruct((n_outer, 1, c), jnp.float32),
        grid=grid,
        in_specs=[pred_spec],
        out_specs=pl.BlockSpec((1, 1, c), lambda o, i: (o, 0, 0)),
        scratch_shapes=[pltpu.VMEM((1, c), jnp.float32)],
        compiler_params=cparams,
    )(cls_score)

    # Tiny (1, C) adaptive weight vector in plain JAX.  (A cross-device psum of
    # sumq_parts would go here to reproduce the all_gather for world_size > 1.)
    avg_q = jnp.sum(sumq_parts, axis=(0, 1)) / jnp.float32(n)   # (C,); bg lane ignored
    w_fg = -jnp.log(jnp.maximum(avg_q[: c - 1], 1e-30))
    final_w = jnp.concatenate([w_fg, jnp.ones((1,), jnp.float32)]).reshape(1, c)

    # ---- pass 2: per-core partial sums of the weighted CE loss --------------
    loss_parts = pl.pallas_call(
        functools.partial(_weighted_ce_kernel, n_rows=n, n_inner=n_inner,
                          tile_rows=tn, slab_rows=slab, ignore_index=ignore_index),
        out_shape=jax.ShapeDtypeStruct((n_outer, 1, 1), jnp.float32),
        grid=grid,
        in_specs=[pred_spec, label_spec,
                  pl.BlockSpec((1, c), lambda o, i: (0, 0))],
        out_specs=pl.BlockSpec((1, 1, 1), lambda o, i: (o, 0, 0)),
        scratch_shapes=[pltpu.VMEM((1, 1), jnp.float32)],
        compiler_params=cparams,
    )(cls_score, label2d, final_w)

    # mmdet weight_reduce_loss(reduction='mean', weight=None, avg_factor=None):
    # plain mean over all N rows (ignored rows contribute 0 to the numerator).
    return jnp.float32(loss_weight) * jnp.sum(loss_parts) / jnp.float32(n)


# --------------------------------------------------------------------------- #
# Pure-JAX reference of the same math, for a correctness check.
# --------------------------------------------------------------------------- #
def _reference(cls_score, label, *, loss_weight=1.0, ignore_index=-100):
    pred = cls_score.astype(jnp.float32)
    n, c = pred.shape
    q_fg = jax.nn.softmax(pred[:, :-1], axis=-1)
    avg_q = jnp.mean(q_fg, axis=0, keepdims=True)
    final_w = jnp.concatenate([-jnp.log(avg_q), jnp.ones((1, 1), jnp.float32)], axis=1)
    scaled = final_w * pred
    logp = jax.nn.log_softmax(scaled, axis=-1)
    col = jnp.arange(c)[None, :]
    loss = -jnp.sum(jnp.where(col == label[:, None], logp, 0.0), axis=-1)
    loss = jnp.where(label != ignore_index, loss, 0.0)
    return loss_weight * jnp.mean(loss)


if __name__ == "__main__":
    num_classes = 127                       # -> C = num_classes + 1 = 128 (lane aligned)
    C = num_classes + 1

    key = jax.random.PRNGKey(0)
    k1, k2 = jax.random.split(key)

    # --- test 1: N=44 with 16-row tiles -> 3 real tiles, grid (2,2) covers 4
    #     logical tiles; exercises the ragged final block AND the clamped-overrun
    #     (fully masked) step, plus ignore_index masking.  No host-side padding.
    N = 44
    cls_score = jax.random.normal(k1, (N, C), dtype=jnp.float32)
    label = jax.random.randint(k2, (N,), 0, C, dtype=jnp.int32)
    label = label.at[3].set(-100)

    loss = jax.block_until_ready(
        ada_rel_iif_loss(cls_score, label, loss_weight=1.0, tile_rows=16))
    ref = _reference(cls_score, label, loss_weight=1.0)
    np.testing.assert_allclose(np.asarray(loss), np.asarray(ref), rtol=1e-2, atol=1e-2)

    # --- test 2: bf16 ingest path (halves the dominant HBM stream). ---
    cls_bf16 = cls_score.astype(jnp.bfloat16)
    loss_bf16 = jax.block_until_ready(
        ada_rel_iif_loss(cls_bf16, label, loss_weight=1.0, tile_rows=16))
    ref_bf16 = _reference(cls_bf16, label, loss_weight=1.0)
    np.testing.assert_allclose(np.asarray(loss_bf16), np.asarray(ref_bf16),
                               rtol=2e-2, atol=2e-2)

    # --- test 3: N=512 with automatic tile sizing -> one 512-row DMA tile split
    #     into two 256-row compute slabs (exercises the pl.loop slab path). ---
    k3, k4 = jax.random.split(k2)
    N2 = 512
    cls2 = jax.random.normal(k3, (N2, C), dtype=jnp.float32)
    lbl2 = jax.random.randint(k4, (N2,), 0, C, dtype=jnp.int32)
    loss2 = jax.block_until_ready(ada_rel_iif_loss(cls2, lbl2, loss_weight=1.0))
    ref2 = _reference(cls2, lbl2, loss_weight=1.0)
    np.testing.assert_allclose(np.asarray(loss2), np.asarray(ref2), rtol=1e-2, atol=1e-2)

    print("KERNEL_OK")
</pallas_src>

<mosaic_0001>
module attributes {stable_mosaic.version = 11 : i64} {
  func.func @_sum_qfg_kernel(%arg0: i32, %arg1: i32, %arg2: memref<16x128xf32, #tpu.memory_space<vmem>>, %arg3: memref<1x1x128xf32, #tpu.memory_space<vmem>>, %arg4: memref<1x128xf32, #tpu.memory_space<vmem>>) attributes {dimension_semantics = [#tpu.dimension_semantics<parallel>, #tpu.dimension_semantics<arbitrary>], iteration_bounds = array<i64: 2, 2>, scalar_prefetch = 0 : i64, scratch_operands = 1 : i64, tpu.core_type = #tpu.core_type<tc>, window_params = [{transform_indices = @transform_0, window_bounds = array<i64: 16, 128>}, {transform_indices = @transform_1, window_bounds = array<i64: 1, 1, 128>}]} {
    %c0_i32 = arith.constant 0 : i32
    %0 = arith.cmpi eq, %arg1, %c0_i32 : i32
    %1 = arith.extui %0 : i1 to i32
    %c0_i32_0 = arith.constant 0 : i32
    %2 = arith.cmpi ne, %1, %c0_i32_0 : i32
    scf.if %2 {
      %cst_17 = arith.constant 0.000000e+00 : f32
      %56 = vector.broadcast %cst_17 : f32 to vector<1x128xf32>
      %c0_18 = arith.constant 0 : index
      %c0_19 = arith.constant 0 : index
      %57 = vector.load %arg4[%c0_18, %c0_19] : memref<1x128xf32, #tpu.memory_space<vmem>>, vector<1x128xf32>
      tpu.vector_store %arg4[%c0_18, %c0_19], %56 {strides = array<i32>} : memref<1x128xf32, #tpu.memory_space<vmem>>, vector<1x128xf32>,
    } else {
    }
    %c2_i32 = arith.constant 2 : i32
    %3 = arith.muli %arg0, %c2_i32 : i32
    %4 = arith.addi %3, %arg1 : i32
    %c16_i32 = arith.constant 16 : i32
    %5 = arith.muli %4, %c16_i32 : i32
    %6 = tpu.iota {dimensions = array<i32: 1>} : vector<1x128xi32>
    %c127_i32 = arith.constant 127 : i32
    %7 = vector.broadcast %c127_i32 : i32 to vector<1x128xi32>
    %8 = arith.cmpi slt, %6, %7 : vector<1x128xi32>
    %9 = tpu.iota {dimensions = array<i32: 0>} : vector<128x1xi32>
    %c127_i32_1 = arith.constant 127 : i32
    %10 = vector.broadcast %c127_i32_1 : i32 to vector<128x1xi32>
    %11 = arith.cmpi slt, %9, %10 : vector<128x1xi32>
    %12 = arith.extui %11 : vector<128x1xi1> to vector<128x1xi32>
    %13 = arith.sitofp %12 : vector<128x1xi32> to vector<128x1xf32>
    %cst = arith.constant 1.000000e+00 : f32
    %14 = vector.broadcast %cst : f32 to vector<1x16xf32>
    %15 = tpu.iota {dimensions = array<i32: 0>} : vector<16x1xi32>
    %c0_i32_2 = arith.constant 0 : i32
    %c1_i32 = arith.constant 1 : i32
    %16 = arith.muli %c0_i32_2, %c1_i32 : i32
    %c0_i32_3 = arith.constant 0 : i32
    %17 = arith.addi %c0_i32_3, %16 : i32
    %c16_i32_4 = arith.constant 16 : i32
    %18 = arith.muli %17, %c16_i32_4 : i32
    %19 = tpu.assume_multiple %18, 16 : i32
    %20 = arith.index_cast %19 : i32 to index
    %c0 = arith.constant 0 : index
    %21 = vector.load %arg2[%20, %c0] : memref<16x128xf32, #tpu.memory_space<vmem>>, vector<16x128xf32>
    %cst_5 = arith.constant -1.000000e+30 : f32
    %22 = vector.shape_cast %8 : vector<1x128xi1> to vector<1x128xi1>
    %23 = vector.broadcast %22 : vector<1x128xi1> to vector<16x128xi1>
    %24 = vector.broadcast %cst_5 : f32 to vector<16x128xf32>
    %25 = arith.select %23, %21, %24 : vector<16x128xi1>, vector<16x128xf32>
    %cst_6 = arith.constant dense<0xFF800000> : vector<16xf32>
    %26 = vector.multi_reduction <maximumf>, %25, %cst_6 [1] : vector<16x128xf32> to vector<16xf32>
    %27 = vector.shape_cast %26 : vector<16xf32> to vector<16x1xf32>
    %28 = vector.shape_cast %8 : vector<1x128xi1> to vector<1x128xi1>
    %29 = vector.broadcast %28 : vector<1x128xi1> to vector<16x128xi1>
    %30 = vector.shape_cast %27 : vector<16x1xf32> to vector<16x1xf32>
    %31 = vector.broadcast %30 : vector<16x1xf32> to vector<16x128xf32>
    %32 = arith.select %29, %21, %31 : vector<16x128xi1>, vector<16x128xf32>
    %33 = vector.broadcast %27 : vector<16x1xf32> to vector<16x128xf32>
    %34 = arith.subf %32, %33 : vector<16x128xf32>
    %35 = math.exp %34 : vector<16x128xf32>
    %cst_7 = arith.constant dense<0.000000e+00> : vector<16x1xf32>
    %36 = tpu.matmul %35, %13, %cst_7 {dimension_numbers = #tpu.dot_dimension_numbers<[1], [0], [0], [1], [0, 0, 1, 1], [], []>} : vector<16x128xf32>, vector<128x1xf32>, vector<16x1xf32> -> vector<16x1xf32>
    %37 = tpu.reciprocal %36 : vector<16x1xf32> -> vector<16x1xf32>
    %38 = vector.broadcast %37 : vector<16x1xf32> to vector<16x128xf32>
    %39 = arith.mulf %35, %38 : vector<16x128xf32>
    %40 = arith.addi %5, %19 : i32
    %41 = vector.broadcast %40 : i32 to vector<16x1xi32>
    %42 = arith.addi %41, %15 : vector<16x1xi32>
    %c44_i32 = arith.constant 44 : i32
    %43 = vector.broadcast %c44_i32 : i32 to vector<16x1xi32>
    %44 = arith.cmpi slt, %42, %43 : vector<16x1xi32>
    %cst_8 = arith.constant 0.000000e+00 : f32
    %45 = vector.shape_cast %44 : vector<16x1xi1> to vector<16x1xi1>
    %46 = vector.broadcast %45 : vector<16x1xi1> to vector<16x128xi1>
    %47 = vector.broadcast %cst_8 : f32 to vector<16x128xf32>
    %48 = arith.select %46, %39, %47 : vector<16x128xi1>, vector<16x128xf32>
    %c0_9 = arith.constant 0 : index
    %c0_10 = arith.constant 0 : index
    %49 = vector.load %arg4[%c0_9, %c0_10] : memref<1x128xf32, #tpu.memory_space<vmem>>, vector<1x128xf32>
    %cst_11 = arith.constant dense<0.000000e+00> : vector<1x128xf32>
    %50 = tpu.matmul %14, %48, %cst_11 {dimension_numbers = #tpu.dot_dimension_numbers<[1], [0], [0], [1], [0, 0, 1, 1], [], []>} : vector<1x16xf32>, vector<16x128xf32>, vector<1x128xf32> -> vector<1x128xf32>
    %51 = arith.addf %49, %50 : vector<1x128xf32>
    %c0_12 = arith.constant 0 : index
    %c0_13 = arith.constant 0 : index
    %52 = vector.load %arg4[%c0_12, %c0_13] : memref<1x128xf32, #tpu.memory_space<vmem>>, vector<1x128xf32>
    tpu.vector_store %arg4[%c0_12, %c0_13], %51 {strides = array<i32>} : memref<1x128xf32, #tpu.memory_space<vmem>>, vector<1x128xf32>,
    %c1_i32_14 = arith.constant 1 : i32
    %c1_i32_15 = arith.constant 1 : i32
    %53 = arith.cmpi eq, %arg1, %c1_i32_15 : i32
    %54 = arith.extui %53 : i1 to i32
    %c0_i32_16 = arith.constant 0 : i32
    %55 = arith.cmpi ne, %54, %c0_i32_16 : i32
    scf.if %55 {
      %c0_17 = arith.constant 0 : index
      %c0_18 = arith.constant 0 : index
      %56 = vector.load %arg4[%c0_17, %c0_18] : memref<1x128xf32, #tpu.memory_space<vmem>>, vector<1x128xf32>
      %57 = vector.shape_cast %56 : vector<1x128xf32> to vector<1x1x128xf32>
      %c0_19 = arith.constant 0 : index
      %c0_20 = arith.constant 0 : index
      %c0_21 = arith.constant 0 : index
      %58 = vector.load %arg3[%c0_19, %c0_20, %c0_21] : memref<1x1x128xf32, #tpu.memory_space<vmem>>, vector<1x1x128xf32>
      tpu.vector_store %arg3[%c0_19, %c0_20, %c0_21], %57 {strides = array<i32>} : memref<1x1x128xf32, #tpu.memory_space<vmem>>, vector<1x1x128xf32>,
    } else {
    }
    return
  }
  func.func @transform_0(%arg0: i32, %arg1: i32) -> (i32, i32) {
    %c2_i32 = arith.constant 2 : i32
    %0 = arith.muli %arg0, %c2_i32 : i32
    %1 = arith.addi %0, %arg1 : i32
    %c2_i32_0 = arith.constant 2 : i32
    %2 = arith.minsi %1, %c2_i32_0 : i32
    %c0_i32 = arith.constant 0 : i32
    %c0_i32_1 = arith.constant 0 : i32
    return %2, %c0_i32 : i32, i32
  }
  func.func @transform_1(%arg0: i32, %arg1: i32) -> (i32, i32, i32) {
    %c0_i32 = arith.constant 0 : i32
    %c0_i32_0 = arith.constant 0 : i32
    %c0_i32_1 = arith.constant 0 : i32
    return %arg0, %c0_i32, %c0_i32_0 : i32, i32, i32
  }
}

</mosaic_0001>

<bundles_post_ra>
// kernel: tpu_custom_call.1
= control target key start
LH: loop header
LB: loop body
LE: loop exit
PB: predicated region body
PF: predicated region fallthrough
CT: control target
= control target key end

     0   :  { %6 = vsyncpa [#allocation4], 0  ;;  %s1175_s0 = inlined_call_operand.hbm [shape: f32[44,128], index: 0, kind: input, shape index: {}]   ;;  %s1176_s1 = inlined_call_operand.hbm [shape: f32[2,1,128], index: 1, kind: output, shape index: {}]  }
   0x1   :  { %8 = vsyncpa [#allocation4 + $0x1], 0 }
   0x2   :  { %9 = vsyncpa [#allocation5], 0 }
   0x3   :  { %11 = vsyncpa [#allocation5 + $0x1], 0  ;;  %s939_s6 = smov 0   ;;  %s941_s7 = smov 0  }
   0x4   :  { %s943_s8 = smov 0   ;;  %s945_s9 = smov 0  }
   0x5   :  { %s947_s10 = smov 0   ;;  %s949_s11 = smov 0  }
   0x6   :  { %s951_s12 = smov 0   ;;  %s953_s13 = smov 0  }
   0x7   :  { %s955_s14 = smov 0   ;;  %s957_s15 = smov 0  }
   0x8   :  { %s959_s16 = smov 0  }
   0x9 LB: > { %s531_s17 = sadd.s32 4294967295, %s915_s16   ;;  %s532_s18 = sadd.s32 4294967294, %s915_s16   ;;  %s915_s16 = sphi %s959_s16, %s17_s16   ;;  %s911_s15 = sphi %s957_s15, %s1194_s15   ;;  %s907_s14 = sphi %s955_s14, %s1193_s14   ;;  %s903_s13 = sphi %s953_s13, %s1192_s13   ;;  %s899_s12 = sphi %s951_s12, %s1191_s12   ;;  %s895_s11 = sphi %s949_s11, %s1190_s11   ;;  %s891_s10 = sphi %s947_s10, %s1189_s10   ;;  %s887_s9 = sphi %s945_s9, %s1188_s9   ;;  %s883_s8 = sphi %s943_s8, %s1187_s8   ;;  %s879_s7 = sphi %s941_s7, %s1186_s7   ;;  %s875_s6 = sphi %s939_s6, %s1185_s6  }
   0xa   : > { %s26_s19 = sadd.s32 1, %s907_s14  ;;  %s29_s20 = sadd.s32 1, %s911_s15 }
   0xb   : > { %p27_p0 = scmp.ge.s32.totalorder %s26_s19, 2  ;;  %s533_s21 = sshll.u32 %s911_s15, 1 }
   0xc   : > { %s34_s22 = sadd.s32 %s907_s14, %s533_s21  ;;  %s44_s23 = sadd.s32 1, %s895_s11 }
   0xd   : > { %s1196_s19 = smov (%p27_p0, %s26_s19), 0  ;;  %s1198_s20 = smov (!%p27_p0, %s29_s20), %s911_s15 }
   0xe   : > { %p35_p1 = scmp.lt.s32.totalorder %s34_s22, 2  ;;  %p51_p2 = scmp.ne.s32.totalorder %s895_s11, %s891_s10 }
   0xf   : > { %p31_p3 = scmp.ge.s32.totalorder %s1198_s20, 2  ;;  %p52_p4 = scmp.eq.s32.totalorder %s915_s16, 0 }
  0x10   : > { %s1200_s22 = smov (!%p35_p1, %s34_s22), 2  ;;  %p57_p6 = scmp.ne.s32.totalorder %s891_s10, %s887_s9 }
  0x11   : > { %s1202_s20 = smov (%p31_p3, %s1198_s20), 0  ;;  %p1009_p5 = por %p52_p4, %p51_p2 }
  0x12   : > { %s534_s25 = sshll.u32 %s1202_s20, 1  ;;  %p58_p7 = scmp.eq.s32.totalorder %s531_s17, 0 }
  0x13   : > { %s38_s26 = sadd.s32 %s534_s25, %s1196_s19  ;;  %s67_s27 = ssub.s32 %s911_s15, %s1202_s20 }
  0x14   : > { %p39_p8 = scmp.lt.s32.totalorder %s38_s26, 2  ;;  %p1021_p9 = por %p58_p7, %p57_p6 }
  0x15   : > { %p68_p10 = scmp.eq.s32.totalorder %s67_s27, 0  ;;  %s70_s29 = sadd.s32 1, %s883_s8 }
  0x16   : > { %s1204_s26 = smov (!%p39_p8, %s38_s26), 2  ;;  %p80_p11 = scmp.ne.s32.totalorder %s883_s8, %s879_s7 }
  0x17   : > { %s1027_s30 = scalar_select %p68_p10, %s883_s8, %s70_s29  }
  0x18   : > { %s41_s2 = ssub.s32 %s1200_s22, %s1204_s26  ;;  %p81_p13 = scmp.eq.s32.totalorder %s531_s17, 3 }
  0x19   : > { %p42_p12 = scmp.eq.s32.totalorder %s41_s2, 0  ;;  %p86_p0 = scmp.ne.s32.totalorder %s879_s7, %s875_s6 }
  0x1a   : > { %p87_p1 = scmp.eq.s32.totalorder %s532_s18, 3  ;;  %p1040_p2 = por %p81_p13, %p80_p11 }
  0x1b   : > { %s1038_s3 = scalar_select %p42_p12, %s895_s11, %s44_s23  }
  0x1c   : > { %s1180_s4 = scalar_select %p1040_p2, 1, 0 }
  0x1d   : > { %p1044_p3 = por %p87_p1, %p86_p0  ;;  %p653_p4 = scmp.lt.s32.totalorder %s915_s16, 4 }
  0x1e   : > { %s107_s9 = sand.u32 1, %s895_s11   ;;  %s555_s21 = sshll.u32 %s1200_s22, 8 }
  0x1f   : > { %s1181_s5 = scalar_select %p1044_p3, 1, 0 }
  0x20   : > { %s537_s25 = sshll.u32 %s107_s9, 4  ;;  %s1053_s17 = scalar_lea.hbm %s1175_s0, %s555_s21 }
  0x21   : > { %s111_s18 = scalar_lea.vmem [#allocation3], %s537_s25  ;;  %p1057_p6 = pnand %p653_p4, %p1009_p5 }
  0x22   : > { %s122_s23 = sshll.u32 %s111_s18, 4  ;;  %s1063_s22 = scalar_lea.sflag [#allocation4], %s107_s9  ;;  %s1061_s23 = int_to_ptr.vmem [resolvable:$true] %s122_s23 }
  0x23   : > { %s763_s2 = scalar_lea.hbm %s1053_s17, 256  ;;  %p765_p8 = pneg %p1057_p6 }
  0x24   : > { %p764_p7 = scmp.ne.s32.totalorder %s1053_s17, %s763_s2  ;;  %s768_s25 = scalar_lea.hbm %s1175_s0, 768 }
  0x25   : > { %p769_p5 = scmp.lt.u32.totalorder %s1053_s17, %s1175_s0  ;;  %p770_p12 = scmp.lt.u32.totalorder %s768_s25, %s763_s2 }
  0x26   : > { %p766_p10 = pnand %p765_p8, %p764_p7  ;;  %p772_p0 = scmp.lt.u32.totalorder %s763_s2, %s1053_s17 }
  0x27   : > { %p771_p13 = por %p770_p12, %p769_p5 }
  0x28   : > { %p767_p11 = pneg %p766_p10 }
  0x29   : > { %p773_p1 = por %p772_p0, %p771_p13 }
  0x2b   : > { %p774_p4 = pnand %p773_p1, %p767_p11 }
  0x2d   : > { %777 = shalt.err (!%p774_p4)
}
  0x2e   : > { %s778_s9 = scalar_lea.vmem %s1061_s23, 256  ;;  %s917_s18 = smov [#allocation3]  }
  0x2f   : > { %p779_p7 = scmp.ne.s32.totalorder %s1061_s23, %s778_s9  ;;  %s783_s21 = sshll.u32 %s917_s18, 4  ;;  %s784_s21 = int_to_ptr.vmem [resolvable:$false] %s783_s21 }
  0x30   : > { %s785_s24 = scalar_lea.vmem %s784_s21, 512  ;;  %p786_p2 = scmp.lt.s32.totalorder %s1061_s23, %s784_s21 }
  0x31   : > { %p781_p10 = pnand %p779_p7, %p765_p8  ;;  %p787_p5 = scmp.lt.s32.totalorder %s785_s24, %s778_s9 }
  0x33   : > { %p782_p3 = pneg %p781_p10  ;;  %p788_p12 = por %p787_p5, %p786_p2 }
  0x35   : > { %p789_p13 = pnand %p788_p12, %p782_p3 }
  0x37   : > { %792 = shalt.err (!%p789_p13)
}
  0x38   : > { %s918_s2 = smov 128   ;;  %s919_s25 = smov 8  }
  0x39   : > { %648 = dma.hbm_to_vmem [thread:$0]  (!%p1057_p6), %s1053_s17, 256, %s1061_s23, %s1063_s22, %s918_s2, %s918_s2, %s919_s25  }
  0x3a   : > { %p541_p8 = scmp.ge.s32.totalorder %s915_s16, 1  ;;  %p130_p11 = scmp.lt.s32.totalorder %s915_s16, 5 }
  0x3c   : > { %p131_p0 = pnand %p541_p8, %p130_p11 }
  0x3d   : > { %s136_s26 = sand.u32 (!%p131_p0), 1, %s891_s10  }
  0x3e   : > { %134 = sbr.rel (%p131_p0) target bundleno = 858 (0x35a), region = 24  ;;  %s542_s27 = sshll.u32 (!%p131_p0), %s136_s26, 4 }
  0x3f   : > { %s137_s9 = scalar_lea.sflag (!%p131_p0), [#allocation4], %s136_s26  ;;  %s140_s18 = scalar_lea.vmem (!%p131_p0), [#allocation3], %s542_s27 }
  0x45   : > { %866 = dma.done.wait (%p1021_p9), %s137_s9, 256  }
  0x46   : > { %868 = vsyncadd (%p1021_p9), %s137_s9, 4294967040  ;;  %s156_s21 = sand.u32 1, %s879_s7   ;;  %p543_p2 = scmp.ne.s32.totalorder %s899_s12, 0 }
  0x47   : > { %s1101_s17 = scalar_lea.vmem [#allocation6], %s156_s21  ;;  %v920_v0 = vmov (!%p543_p2), 0.0  }
  0x48   : > { %166 = sbr.rel (%p543_p2) target bundleno = 79 (0x4f), region = 32  ;;  %167 = vst [vmem:[#allocation2] sm:$0x1] (!%p543_p2), %v920_v0 }
  0x4f PF: > { %v171_v1 = vlaneseq  ;;  %v921_v2 = vmov 1.0|1.0   ;;  %v239_v4 = vld [vmem:[%s140_s18] sm:$0xff]  ;;  %v240_v5 = vld [vmem:[%s140_s18 + $0x8] sm:$0xff]  ;;  %vm922_vm2 = vmmov 1   ;;  %v923_v20 = vmov 0  }
  0x50   : > { %619 = vmatprep.subr.bf16.mxu0 %v921_v2  ;;  %753 = vset.pattern.permute.xlu1 %v923_v20  ;;  %v924_v25 = vmov 0.0|0.0   ;;  %vm925_vm4 = vmmov 0   ;;  %v926_v26 = vmov 0.0   ;;  %s544_s28 = sshll.u32 %s903_s13, 1  ;;  %vm359_vm8 = vcmask 130048   ;;  %p551_p9 = scmp.ne.s32.totalorder %s899_s12, 1 }
  0x51   : > { %v172_v3 = vand.u32 127, %v171_v1  ;;  %620 = vmatpush3.bf16.msra.mxu0 %v921_v2  ;;  %v175_v8 = vshrl.u32 %v171_v1, 7  ;;  %754 = vset.pattern.permute.xlu0 %v923_v20  ;;  %s169_s23 = sadd.s32 %s899_s12, %s544_s28  ;;  %v927_v36 = vmov 1.0   ;;  %v358_v37 = vld [vmem:[#allocation2] sm:$0x1] }
  0x52   : > { %621 = vmatprep.subr.bf16.mxu0 %v921_v2  ;;  %637 = vmatprep.subr.bf16.mxu1 %v924_v25  ;;  %s545_s29 = sshll.u32 %s169_s23, 4 }
  0x53   : > { %vm173_vm0 = vcmp.lt.s32.totalorder %v172_v3, 127  ;;  %v190_v9 = vadd.s32 120, %v175_v8  ;;  %616 = vmatprep.mubr.msk.f32.mxu1 %vm925_vm4, %v926_v26  ;;  %v176_v27 = vadd.s32 8, %v175_v8  ;;  %v347_v28 = vstv %s545_s29 }
  0x54   : > { %v243_v6 = vsel %vm173_vm0, %v239_v4, -1e+30  ;;  %v244_v7 = vsel %vm173_vm0, %v240_v5, -1e+30  ;;  %v348_v29 = vadd.s32 %v347_v28, %v175_v8 }
  0x55   : > { %245 = vmax.xlane.f32.xlu0 %v243_v6  ;;  %622 = vmatpush3.bf16.msra.mxu0 %v921_v2  ;;  %vm206_vm1 = vcmp.lt.s32.totalorder %v190_v9, 127  ;;  %v349_v30 = vadd.s32 %v347_v28, %v176_v27 }
  0x56   : > { %623 = vmatprep.subr.bf16.mxu0 %v921_v2  ;;  %vm633_vm3 = vmpackc.low %vm206_vm1, %vm922_vm2  ;;  %vm350_vm5 = vcmp.lt.s32.totalorder %v348_v29, 44 }
  0x57   : > { %vm351_vm6 = vcmp.lt.s32.totalorder %v349_v30, 44 }
  0x58   : > { %vm639_vm7 = vmpackc.low %vm351_vm6, %vm350_vm5 }
  0x59   : > { %247 = vmax.xlane.f32.xlu0 %v244_v7  ;;  %624 = vmatpush3.bf16.msra.mxu0 %v921_v2 }
  0x5a   : > { %625 = vmatprep.subr.bf16.mxu0 %v921_v2 }
  0x5d   : > { %626 = vmatpush3.bf16.msra.mxu0 %v921_v2 }
  0x5e   : > { %627 = vmatprep.subr.bf16.mxu0 %v921_v2 }
  0x61   : > { %628 = vmatpush3.bf16.msra.mxu0 %v921_v2 }
  0x62   : > { %629 = vmatprep.subr.bf16.mxu0 %v921_v2 }
  0x65   : > { %630 = vmatpush3.bf16.msra.mxu0 %v921_v2 }
  0x66   : > { %631 = vmatprep.subr.bf16.mxu0 %v921_v2 }
  0x69   : > { %632 = vmatpush3.bf16.msra.mxu0 %v921_v2 }
  0x6a   : > { %634 = vmatprep.subr.msk.bf16.mxu0 %vm633_vm3, %v921_v2 }
  0x6d   : > { %636 = vmatpush3.bf16.msk.msra.mxu0 %vm633_vm3, %v921_v2 }
  0xe2   : > { %v246_v10 = vpop.xlane.xlu0 %245 }
  0xe3   : > { %v249_v11 = vsel %vm173_vm0, %v239_v4, %v246_v10 }
  0xe4   : > { %v251_v12 = vsub.f32 %v249_v11, %v246_v10 }
  0xe6   : > { %v253_v13 = vmul.f32 1.442695, %v251_v12  ;;  %v248_v14 = vpop.xlane.xlu0 %247 }
  0xe7   : > { %v250_v15 = vsel %vm173_vm0, %v240_v5, %v248_v14 }
  0xe8   : > { %755 = vpow2.f32 %v253_v13  ;;  %v252_v16 = vsub.f32 %v250_v15, %v248_v14 }
  0xea   : > { %v255_v17 = vmul.f32 1.442695, %v252_v16 }
  0xec   : > { %757 = vpow2.f32 %v255_v17 }
  0xf2   : > { %v756_v18 = vpop.eup %755 }
  0xf3   : > { %609 = vmatprep.mubr.f32.mxu0 %v756_v18 }
  0xf6   : > { %v758_v19 = vpop.eup %757 }
  0xf7   : > { %610 = vmatmul.mubr.f32.vlgmr.msra.gmra.mrb[0].mxu0 %v758_v19 }
 0x1ca   : > { %v611_v21 = vpop.f32.mrb[0].mxu0 }
 0x1cb   : > { %v323_v22 = vpop.f32.mrb[1].mxu0 }
 0x1cc   : > { %759 = vrcp.f32 %v323_v22 }
 0x1cd   : > { %761 = vrcp.f32 %v611_v21 }
 0x1d6   : > { %v760_v23 = vpop.eup %759 }
 0x1d7   : > { %336 = vperm.xlu1 %753, %v760_v23   ;;  %v762_v24 = vpop.eup %761 }
 0x1db   : > { %341 = vperm.xlu1 %753, %v762_v24  }
 0x256   : > { %v337_v31 = vpop.permute.xlu1 %336 }
 0x257   : > { %v344_v33 = vmul.f32 %v756_v18, %v337_v31 }
 0x25a   : > { %v342_v32 = vpop.permute.xlu1 %341 }
 0x25b   : > { %v345_v34 = vmul.f32 %v758_v19, %v342_v32 }
 0x25d   : > { %v638_v35 = vpack.c.bf16 %v345_v34, %v344_v33 }
 0x25f   : > { %640 = vmatpush3.bf16.msk.msra.mxu1 %vm639_vm7, %v638_v35 }
 0x262   : > { %617 = vmatmul.mubr.msk.f32.vlgmr.msra.gmra.mrb[0].mxu1 %vm359_vm8, %v927_v36 }
 0x332   : > { %438 = sbr.rel (%p551_p9) target bundleno = 833 (0x341), region = 36 }
 0x335   : > { %v429_v38 = vpop.f32.mrb[0].mxu1 }
 0x336   : > { %v433_v39 = vadd.f32 %v429_v38, %v358_v37  ;;  %v618_v40 = vpop.f32.mrb[1].mxu1 }
 0x338   : > { %434 = vst [vmem:[#allocation2] sm:$0x1] %v433_v39 }
 0x33f   : > { %v439_v41 = vld [vmem:[#allocation2] sm:$0x1] }
 0x340   : > { %440 = vst [vmem:[%s1101_s17] sm:$0x1] %v439_v41 }
 0x341 PF: > { %s552_s22 = sshll.u32 %s903_s13, 4  ;;  %s454_s26 = sshll.u32 %s1101_s17, 4  ;;  %s455_s26 = int_to_ptr.vmem [resolvable:$true] %s454_s26 }
 0x342   : > { %s1116_s25 = scalar_lea.hbm %s1176_s1, %s552_s22  ;;  %s442_s27 = scalar_lea.sflag [#allocation5], %s156_s21 }
 0x343   : > { %s793_s12 = scalar_lea.vmem %s455_s26, 16  ;;  %p1183_p6 = scmp.ne.s32.totalorder %s1180_s4, 0 }
 0x344   : > { %p794_p3 = scmp.ne.s32.totalorder %s455_s26, %s793_s12  ;;  %s928_s9 = smov [#allocation6]  }
 0x345   : > { %s797_s18 = sshll.u32 %s928_s9, 4  ;;  %s798_s18 = int_to_ptr.vmem [resolvable:$false] %s797_s18 }
 0x346   : > { %p795_p1 = pnand %p794_p3, %p1183_p6  ;;  %s799_s28 = scalar_lea.vmem %s798_s18, 32 }
 0x347   : > { %p800_p7 = scmp.lt.s32.totalorder %s455_s26, %s798_s18  ;;  %p801_p10 = scmp.lt.s32.totalorder %s799_s28, %s793_s12 }
 0x348   : > { %p796_p4 = pneg %p795_p1 }
 0x349   : > { %p802_p5 = por %p801_p10, %p800_p7 }
 0x34b   : > { %p803_p12 = pnand %p802_p5, %p796_p4 }
 0x34d   : > { %806 = shalt.err (!%p803_p12)
}
 0x34e   : > { %s807_s13 = scalar_lea.hbm %s1116_s25, 16  ;;  %s811_s23 = scalar_lea.hbm %s1176_s1, 32 }
 0x34f   : > { %p808_p13 = scmp.ne.s32.totalorder %s1116_s25, %s807_s13  ;;  %p812_p0 = scmp.lt.u32.totalorder %s1116_s25, %s1176_s1 }
 0x350   : > { %p813_p2 = scmp.lt.u32.totalorder %s811_s23, %s807_s13  ;;  %p815_p3 = scmp.lt.u32.totalorder %s807_s13, %s1116_s25 }
 0x351   : > { %p809_p8 = pnand %p808_p13, %p1183_p6 }
 0x352   : > { %p814_p9 = por %p813_p2, %p812_p0 }
 0x353   : > { %p810_p11 = pneg %p809_p8 }
 0x354   : > { %p816_p1 = por %p815_p3, %p814_p9 }
 0x356   : > { %p817_p4 = pnand %p816_p1, %p810_p11 }
 0x358   : > { %820 = shalt.err (!%p817_p4)
}
 0x359   : > { %643 = dma.vmem_to_hbm [thread:$0]  (%p1183_p6), %s455_s26, 16, %s1116_s25, %s442_s27  }
 0x35a PF: > { %p654_p7 = scmp.ge.s32.totalorder %s915_s16, 2  ;;  %s466_s24 = sand.u32 1, %s875_s6  }
 0x35b   : > { %p1184_p10 = scmp.ne.s32.totalorder %s1181_s5, 0  ;;  %s467_s2 = scalar_lea.sflag [#allocation5], %s466_s24 }
 0x35d   : > { %p650_p5 = pnand %p654_p7, %p1184_p10 }
 0x35f   : > { %870 = dma.done.wait (!%p650_p5), %s467_s2, 16  }
 0x360   : > { %872 = vsyncadd (!%p650_p5), %s467_s2, 4294967280  ;;  %s17_s16 = sadd.s32 1, %s915_s16   ;;  %s1185_s6 = smov %s879_s7 }
 0x361   : > { %p14_p12 = scmp.ge.s32.totalorder %s17_s16, 6   ;;  %s1186_s7 = smov %s883_s8 }
 0x362   : > { %s1187_s8 = smov %s1027_s30  ;;  %s1188_s9 = smov %s891_s10 }
 0x363   : > { %s1189_s10 = smov %s895_s11  ;;  %s1190_s11 = smov %s1038_s3 }
 0x364   : > { %s1191_s12 = smov %s907_s14  ;;  %s1192_s13 = smov %s911_s15 }
 0x365   : > { %s1193_s14 = smov %s1196_s19  ;;  %s1194_s15 = smov %s1202_s20 }
 0x366   :  { %16 = sbr.rel (!%p14_p12) target bundleno = 9 (0x9), region = 77 }
 0x36d   :  { %471 = vsyncpa [#allocation4], 1 }
 0x36e   :  { %473 = vsyncpa [#allocation4 + $0x1], 1 }
 0x36f   :  { %474 = vsyncpa [#allocation5], 1 }
 0x370   :  { %476 = vsyncpa [#allocation5 + $0x1], 1 }

</bundles_post_ra>
